<compile_context>
chip_gen: v7x
topology: tpu7x:2x2x1
jax: 0.10.0
libtpu: 0.0.40
codegen_flags: <defaults>
</compile_context>

<pallas_src>
import functools

import jax
import jax.numpy as jnp
from jax.experimental import pallas as pl
from jax.experimental.pallas import tpu as pltpu


def _round_up(x, m):
    return ((x + m - 1) // m) * m


def bp_kernel(x_ref, w1_ref, b1_ref, w2_ref, b2_ref, o_ref):
    cdt = w1_ref.dtype
    # linear_1: x @ W1^T + b1   (W1 pre-transposed to [d_in, d_h]).
    # Cast to the MXU compute dtype in-kernel; the small K dim is padded by
    # Mosaic inside VMEM — no HBM-side padding or extra pass over x.
    x = x_ref[...].astype(cdt)
    h = jnp.dot(x, w1_ref[...], preferred_element_type=jnp.float32)
    h = h + b1_ref[...]                      # f32 bias add (b1 is (1, d_h))
    # activ_1: sigmoid in f32 (EUP path; safe on v5e which lacks bf16 VPU/EUP).
    h = jax.nn.sigmoid(h)
    # linear_2: h @ W2^T + b2
    out = jnp.dot(h.astype(cdt), w2_ref[...], preferred_element_type=jnp.float32)
    out = out + b2_ref[...]
    o_ref[...] = out.astype(o_ref.dtype)


def prepare_params(w1, b1, w2, b2, *, compute_dtype=jnp.bfloat16):
    """One-time prep: transpose weights to [in, out] and cast to the MXU
    compute dtype; keep biases in f32 for the elementwise path.  No padding —
    Mosaic pads small dims inside VMEM and the kernel stores the true
    (unpadded) d_out width."""
    return {
        "w1_t": jnp.asarray(w1.T, compute_dtype),
        "b1": jnp.asarray(b1, jnp.float32).reshape(1, -1),
        "w2_t": jnp.asarray(w2.T, compute_dtype),
        "b2": jnp.asarray(b2, jnp.float32).reshape(1, -1),
    }


@functools.partial(jax.jit, static_argnames=("tile_m",))
def bp_forward(x, params, *, tile_m=512):
    """x: [B, d_in] (any float dtype). Returns [B, d_out] in x.dtype."""
    w1_t, b1 = params["w1_t"], params["b1"]
    w2_t, b2 = params["w2_t"], params["b2"]
    B, d_in = x.shape
    d_h = w1_t.shape[1]
    d_out = w2_t.shape[1]
    out_dtype = x.dtype

    # Adaptive batch tile: never pad a tiny batch up to a huge row tile; keep
    # the sublane (second-to-last) block dim a multiple of 8.
    tile_m_eff = min(tile_m, _round_up(B, 8))
    # v7x has two TensorCores: give the "parallel" batch axis >= 2 tiles to
    # shard when the batch is big enough to split.
    if pl.cdiv(B, tile_m_eff) < 2 and B >= 32:
        tile_m_eff = _round_up(pl.cdiv(B, 2), 8)
    grid = (pl.cdiv(B, tile_m_eff),)
    # Non-divisible grids are fine: Pallas clamps the last block's DMA on read
    # and masks out-of-bounds rows on write, so no wrapper padding or
    # post-call slice is needed.

    # Advisory cost estimate (now matches real, unpadded HBM traffic).
    w_itemsize = w1_t.dtype.itemsize
    flops = 2 * B * (d_in * d_h + d_h * d_out)
    bytes_accessed = (
        B * d_in * x.dtype.itemsize                 # x
        + (d_in * d_h + d_h * d_out) * w_itemsize   # W1, W2
        + (d_h + d_out) * 4                         # biases (f32)
        + B * d_out * jnp.dtype(out_dtype).itemsize # output
    )
    cost = pl.CostEstimate(flops=flops, transcendentals=B * d_h,
                           bytes_accessed=bytes_accessed)

    # Weights/biases: whole-array VMEM residents (staged once, not
    # double-buffered per grid step).  Only x / out tiles stream over the grid.
    resident = pl.BlockSpec(memory_space=pltpu.MemorySpace.VMEM)

    # Raise the scoped-VMEM limit only when the residents need it (v5e's
    # default scoped limit is 16 MiB of the 128 MiB physical).
    resident_bytes = (d_in * d_h + d_h * d_out) * w_itemsize + (d_h + d_out) * 4
    tile_bytes = 2 * tile_m_eff * (d_in * x.dtype.itemsize
                                   + d_out * jnp.dtype(out_dtype).itemsize)
    cp_kwargs = dict(dimension_semantics=("parallel",))
    needed = resident_bytes + tile_bytes + (4 << 20)
    if needed > (12 << 20):
        cp_kwargs["vmem_limit_bytes"] = int(min(2 * needed, 100 << 20))

    out = pl.pallas_call(
        bp_kernel,
        out_shape=jax.ShapeDtypeStruct((B, d_out), out_dtype),
        grid_spec=pltpu.PrefetchScalarGridSpec(
            num_scalar_prefetch=0,
            grid=grid,
            in_specs=[
                pl.BlockSpec((tile_m_eff, d_in), lambda i: (i, 0)),  # x tile
                resident,                                            # W1^T
                resident,                                            # b1
                resident,                                            # W2^T
                resident,                                            # b2
            ],
            out_specs=pl.BlockSpec((tile_m_eff, d_out), lambda i: (i, 0)),
        ),
        compiler_params=pltpu.CompilerParams(**cp_kwargs),
        cost_estimate=cost,
    )(x, w1_t, b1, w2_t, b2)
    return out


def init_params(key, layers, dtype=jnp.float32):
    """Deterministic init mimicking nn.Linear default (U(-1/sqrt(fan_in), +))."""
    k1, k2, k3, k4 = jax.random.split(key, 4)
    bound1 = 1.0 / jnp.sqrt(layers[0])
    bound2 = 1.0 / jnp.sqrt(layers[1])
    w1 = jax.random.uniform(k1, (layers[1], layers[0]), dtype, -bound1, bound1)
    b1 = jax.random.uniform(k2, (layers[1],), dtype, -bound1, bound1)
    w2 = jax.random.uniform(k3, (layers[2], layers[1]), dtype, -bound2, bound2)
    b2 = jax.random.uniform(k4, (layers[2],), dtype, -bound2, bound2)
    return w1, b1, w2, b2


if __name__ == "__main__":
    layers = [32, 64, 16]          # [in, hidden, out]
    batch = 8

    key = jax.random.PRNGKey(0)
    kx, kp = jax.random.split(key)
    x = jax.random.normal(kx, (batch, layers[0]), jnp.float32)
    w1, b1, w2, b2 = init_params(kp, layers)

    # Pure-JAX reference (matches the PyTorch module semantics).
    ref = jax.nn.sigmoid(x @ w1.T + b1) @ w2.T + b2

    # f32 compute path (close match against the reference).
    prep_f32 = prepare_params(w1, b1, w2, b2, compute_dtype=jnp.float32)
    out_f32 = bp_forward(x, prep_f32)
    jax.block_until_ready(out_f32)
    assert out_f32.shape == (batch, layers[2])
    assert jnp.allclose(out_f32, ref, atol=2e-3, rtol=2e-3), \
        float(jnp.max(jnp.abs(out_f32 - ref)))

    # bf16 MXU path (recommended on v6e/v7x; v7x's MXU is bf16/fp8-only).
    prep_bf16 = prepare_params(w1, b1, w2, b2, compute_dtype=jnp.bfloat16)
    out_bf16 = bp_forward(x, prep_bf16)
    jax.block_until_ready(out_bf16)
    assert out_bf16.shape == (batch, layers[2])
    assert jnp.allclose(out_bf16, ref, atol=5e-2, rtol=5e-2), \
        float(jnp.max(jnp.abs(out_bf16 - ref)))

    print("KERNEL_OK")
</pallas_src>

<mosaic_0001>
module attributes {stable_mosaic.version = 11 : i64} {
  func.func @bp_kernel(%arg0: i32, %arg1: memref<8x32xf32, #tpu.memory_space<vmem>>, %arg2: memref<32x64xf32, #tpu.memory_space<vmem>>, %arg3: memref<1x64xf32, #tpu.memory_space<vmem>>, %arg4: memref<64x16xf32, #tpu.memory_space<vmem>>, %arg5: memref<1x16xf32, #tpu.memory_space<vmem>>, %arg6: memref<8x16xf32, #tpu.memory_space<vmem>>) attributes {dimension_semantics = [#tpu.dimension_semantics<parallel>], iteration_bounds = array<i64: 1>, scalar_prefetch = 0 : i64, scratch_operands = 0 : i64, tpu.core_type = #tpu.core_type<tc>, window_params = [{transform_indices = @transform_0, window_bounds = array<i64: 8, 32>}, {pipeline_mode = #tpu.pipeline_mode<synchronous>, transform_indices = @transform_1, window_bounds = array<i64: 32, 64>}, {pipeline_mode = #tpu.pipeline_mode<synchronous>, transform_indices = @transform_2, window_bounds = array<i64: 1, 64>}, {pipeline_mode = #tpu.pipeline_mode<synchronous>, transform_indices = @transform_3, window_bounds = array<i64: 64, 16>}, {pipeline_mode = #tpu.pipeline_mode<synchronous>, transform_indices = @transform_4, window_bounds = array<i64: 1, 16>}, {transform_indices = @transform_5, window_bounds = array<i64: 8, 16>}]} {
    %c0 = arith.constant 0 : index
    %c0_0 = arith.constant 0 : index
    %0 = vector.load %arg1[%c0, %c0_0] : memref<8x32xf32, #tpu.memory_space<vmem>>, vector<8x32xf32>
    %c0_1 = arith.constant 0 : index
    %c0_2 = arith.constant 0 : index
    %1 = vector.load %arg2[%c0_1, %c0_2] : memref<32x64xf32, #tpu.memory_space<vmem>>, vector<32x64xf32>
    %cst = arith.constant dense<0.000000e+00> : vector<8x64xf32>
    %2 = tpu.matmul %0, %1, %cst {dimension_numbers = #tpu.dot_dimension_numbers<[1], [0], [0], [1], [0, 0, 1, 1], [], []>} : vector<8x32xf32>, vector<32x64xf32>, vector<8x64xf32> -> vector<8x64xf32>
    %c0_3 = arith.constant 0 : index
    %c0_4 = arith.constant 0 : index
    %3 = vector.load %arg3[%c0_3, %c0_4] : memref<1x64xf32, #tpu.memory_space<vmem>>, vector<1x64xf32>
    %4 = vector.broadcast %3 : vector<1x64xf32> to vector<8x64xf32>
    %5 = arith.addf %2, %4 : vector<8x64xf32>
    %6 = arith.negf %5 : vector<8x64xf32>
    %7 = math.exp %6 : vector<8x64xf32>
    %cst_5 = arith.constant 1.000000e+00 : f32
    %8 = vector.broadcast %cst_5 : f32 to vector<8x64xf32>
    %9 = arith.addf %8, %7 : vector<8x64xf32>
    %10 = arith.divf %8, %9 : vector<8x64xf32>
    %c0_6 = arith.constant 0 : index
    %c0_7 = arith.constant 0 : index
    %11 = vector.load %arg4[%c0_6, %c0_7] : memref<64x16xf32, #tpu.memory_space<vmem>>, vector<64x16xf32>
    %cst_8 = arith.constant dense<0.000000e+00> : vector<8x16xf32>
    %12 = tpu.matmul %10, %11, %cst_8 {dimension_numbers = #tpu.dot_dimension_numbers<[1], [0], [0], [1], [0, 0, 1, 1], [], []>} : vector<8x64xf32>, vector<64x16xf32>, vector<8x16xf32> -> vector<8x16xf32>
    %c0_9 = arith.constant 0 : index
    %c0_10 = arith.constant 0 : index
    %13 = vector.load %arg5[%c0_9, %c0_10] : memref<1x16xf32, #tpu.memory_space<vmem>>, vector<1x16xf32>
    %14 = vector.broadcast %13 : vector<1x16xf32> to vector<8x16xf32>
    %15 = arith.addf %12, %14 : vector<8x16xf32>
    %c0_11 = arith.constant 0 : index
    %c0_12 = arith.constant 0 : index
    %16 = vector.load %arg6[%c0_11, %c0_12] : memref<8x16xf32, #tpu.memory_space<vmem>>, vector<8x16xf32>
    tpu.vector_store %arg6[%c0_11, %c0_12], %15 {strides = array<i32>} : memref<8x16xf32, #tpu.memory_space<vmem>>, vector<8x16xf32>,
    return
  }
  func.func @transform_0(%arg0: i32) -> (i32, i32) {
    %c0_i32 = arith.constant 0 : i32
    %c0_i32_0 = arith.constant 0 : i32
    return %arg0, %c0_i32 : i32, i32
  }
  func.func @transform_1(%arg0: i32) -> (i32, i32) {
    %c0_i32 = arith.constant 0 : i32
    %c0_i32_0 = arith.constant 0 : i32
    %c0_i32_1 = arith.constant 0 : i32
    return %c0_i32, %c0_i32_0 : i32, i32
  }
  func.func @transform_2(%arg0: i32) -> (i32, i32) {
    %c0_i32 = arith.constant 0 : i32
    %c0_i32_0 = arith.constant 0 : i32
    %c0_i32_1 = arith.constant 0 : i32
    return %c0_i32, %c0_i32_0 : i32, i32
  }
  func.func @transform_3(%arg0: i32) -> (i32, i32) {
    %c0_i32 = arith.constant 0 : i32
    %c0_i32_0 = arith.constant 0 : i32
    %c0_i32_1 = arith.constant 0 : i32
    return %c0_i32, %c0_i32_0 : i32, i32
  }
  func.func @transform_4(%arg0: i32) -> (i32, i32) {
    %c0_i32 = arith.constant 0 : i32
    %c0_i32_0 = arith.constant 0 : i32
    %c0_i32_1 = arith.constant 0 : i32
    return %c0_i32, %c0_i32_0 : i32, i32
  }
  func.func @transform_5(%arg0: i32) -> (i32, i32) {
    %c0_i32 = arith.constant 0 : i32
    %c0_i32_0 = arith.constant 0 : i32
    return %arg0, %c0_i32 : i32, i32
  }
}

</mosaic_0001>

<bundles_post_ra>
// kernel: bp_forward.1
= control target key start
LH: loop header
LB: loop body
LE: loop exit
PB: predicated region body
PF: predicated region fallthrough
CT: control target
= control target key end

     0   :  { %v317_v3 = vmov 0.0|0.0   ;;  %vm318_vm0 = vmmov 0   ;;  %v319_v6 = vmov 0.0   ;;  %s408_s0 = inlined_call_operand.vmem [shape: f32[8,32], index: 0, kind: input, shape index: {}]   ;;  %s409_s1 = inlined_call_operand.vmem [shape: f32[32,64], index: 1, kind: input, shape index: {}]   ;;  %s410_s2 = inlined_call_operand.vmem [shape: f32[1,64], index: 2, kind: input, shape index: {}]   ;;  %s411_s3 = inlined_call_operand.vmem [shape: f32[64,16], index: 3, kind: input, shape index: {}]   ;;  %s412_s4 = inlined_call_operand.vmem [shape: f32[1,16], index: 4, kind: input, shape index: {}]   ;;  %s413_s5 = inlined_call_operand.hbm [shape: f32[8,16], index: 5, kind: output, shape index: {}]  }
   0x1   :  { %v22_v0 = vld [vmem:[%s409_s1] sm:$0xff]  ;;  %v23_v1 = vld [vmem:[%s409_s1 + $0x8] sm:$0xff]  ;;  %v24_v2 = vld [vmem:[%s409_s1 + $0x10] sm:$0xff]  ;;  %267 = vmatprep.subr.bf16.mxu0 %v317_v3  ;;  %245 = vmatprep.mubr.msk.f32.mxu0 %vm318_vm0, %v319_v6 }
   0x2   :  { %v268_v4 = vpack.c.bf16 %v23_v1, %v22_v0  ;;  %v25_v5 = vld [vmem:[%s409_s1 + $0x18] sm:$0xff]  ;;  %273 = vmatprep.subr.bf16.mxu1 %v317_v3  ;;  %264 = vmatprep.mubr.msk.f32.mxu1 %vm318_vm0, %v319_v6 }
   0x3   :  { %10 = vsyncpa [#allocation3], 0  ;;  %v271_v7 = vpack.c.bf16 %v25_v5, %v24_v2  ;;  %v21_v8 = vld [vmem:[%s408_s0] sm:$0xff]  ;;  %vm33_vm1 = vcmask 261120   ;;  %v114_v10 = vld [vmem:[%s411_s3 + $0x8] sm:$0xff]  ;;  %vm128_vm2 = vcmask 523264  }
   0x4   :  { %269 = vmatpush3.bf16.msra.mxu0 %v268_v4  ;;  %v113_v9 = vld [vmem:[%s411_s3] sm:$0xff]  ;;  %v115_v12 = vld [vmem:[%s411_s3 + $0x10] sm:$0xff]  ;;  %v116_v13 = vld [vmem:[%s411_s3 + $0x18] sm:$0xff]  ;;  %s320_s20 = smov [#allocation2]   ;;  %vm202_vm3 = vcmask 130048  }
   0x5   :  { %270 = vmatprep.subr.bf16.mxu0 %v317_v3  ;;  %v274_v11 = vpack.c.bf16 %v114_v10, %v113_v9  ;;  %v277_v14 = vpack.c.bf16 %v116_v13, %v115_v12  ;;  %v117_v15 = vld [vmem:[%s411_s3 + $0x20] sm:$0xff]  ;;  %v118_v16 = vld [vmem:[%s411_s3 + $0x28] sm:$0xff]  ;;  %v119_v18 = vld [vmem:[%s411_s3 + $0x30] sm:$0xff]  ;;  %s210_s21 = sshll.u32 %s320_s20, 4  ;;  %s211_s21 = int_to_ptr.vmem [resolvable:$true] %s210_s21 }
   0x6   :  { %v280_v17 = vpack.c.bf16 %v118_v16, %v117_v15  ;;  %v120_v19 = vld [vmem:[%s411_s3 + $0x38] sm:$0xff]  ;;  %v218_v21 = vld [vmem:[%s410_s2] ss:$0 sm:$0xff]  ;;  %s293_s2 = scalar_lea.vmem %s211_s21, 128  ;;  %p298_p1 = scmp.lt.s32.totalorder %s211_s21, %s211_s21 }
   0x7   :  { %275 = vmatpush3.bf16.msra.mxu1 %v274_v11  ;;  %v283_v20 = vpack.c.bf16 %v120_v19, %v119_v18  ;;  %v221_v29 = vld [vmem:[%s412_s4] ss:$0 sm:$0xff]  ;;  %p294_p0 = scmp.ne.s32.totalorder %s211_s21, %s293_s2  ;;  %p299_p2 = scmp.lt.s32.totalorder %s293_s2, %s293_s2 }
   0x8   :  { %272 = vmatpush3.bf16.msra.mxu0 %v271_v7  ;;  %276 = vmatprep.subr.bf16.mxu1 %v317_v3 }
   0x9   :  { %p300_p3 = por %p299_p2, %p298_p1 }
   0xb   :  { %246 = vmatmul.mubr.msk.f32.vlgmr.msra.gmra.mrb[0].mxu0 %vm33_vm1, %v21_v8  ;;  %278 = vmatpush3.bf16.msra.mxu1 %v277_v14  ;;  %p301_p4 = pnand %p300_p3, %p294_p0 }
   0xc   :  { %279 = vmatprep.subr.bf16.mxu1 %v317_v3 }
   0xf   :  { %281 = vmatpush3.bf16.msra.mxu1 %v280_v17 }
  0x10   :  { %282 = vmatprep.subr.bf16.mxu1 %v317_v3 }
  0x13   :  { %284 = vmatpush3.bf16.msra.mxu1 %v283_v20 }
  0xde   :  { %v103_v22 = vpop.f32.mrb[0].mxu0 }
  0xdf   :  { %v104_v23 = vadd.f32 %v218_v21, %v103_v22  ;;  %v247_v24 = vpop.f32.mrb[1].mxu0 }
  0xe1   :  { %v220_v25 = vmul.f32 -1.442695, %v104_v23 }
  0xe3   :  { %289 = vpow2.f32 %v220_v25 }
  0xed   :  { %v290_v26 = vpop.eup %289 }
  0xee   :  { %v110_v27 = vadd.f32 1.0, %v290_v26 }
  0xf0   :  { %291 = vrcp.f32 %v110_v27 }
  0xfa   :  { %v292_v28 = vpop.eup %291 }
  0xfb   :  { %265 = vmatmul.mubr.msk.f32.vlgmr.msra.gmra.mrb[0].mxu1 %vm128_vm2, %v292_v28 }
 0x1ce   :  { %v198_v30 = vpop.f32.mrb[0].mxu1 }
 0x1cf   :  { %v199_v31 = vadd.f32 %v221_v29, %v198_v30  ;;  %v266_v32 = vpop.f32.mrb[1].mxu1 }
 0x1d1   :  { %203 = vst.msk [vmem:[#allocation2] sm:$0xff] %vm202_vm3, %v199_v31 }
 0x1d2   :  { %304 = shalt.err (!%p301_p4)
}
 0x1d3   :  { %s305_s24 = scalar_lea.hbm %s413_s5, 128 }
 0x1d4   :  { %p306_p5 = scmp.ne.s32.totalorder %s413_s5, %s305_s24  ;;  %p309_p6 = scmp.lt.u32.totalorder %s305_s24, %s413_s5 }
 0x1d6   :  { %p311_p7 = pnand %p309_p6, %p306_p5 }
 0x1d8   :  { %314 = shalt.err (!%p311_p7)
}
 0x1d9   :  { %213 = dma.vmem_to_hbm [thread:$0]  %s211_s21, 128, %s413_s5, [#allocation3]  }
 0x1da   :  { %315 = dma.done.wait [#allocation3], 128  }
 0x1db   :  { %316 = vsyncadd [#allocation3], 4294967168 }
 0x1dc   :  { %217 = vsyncpa [#allocation3], 1 }

</bundles_post_ra>
